<compile_context>
chip_gen: v7x
topology: tpu7x:2x2x1
jax: 0.10.0
libtpu: 0.0.40
codegen_flags: <defaults>
</compile_context>

<pallas_src>
import jax
import jax.numpy as jnp
from jax.experimental import pallas as pl
from jax.experimental.pallas import tpu as pltpu


def _dma_copy_kernel(x_hbm, o_hbm, sem):
    # Single whole-array HBM->HBM DMA: zero compute, zero VMEM staging.
    cp = pltpu.make_async_copy(x_hbm, o_hbm, sem)
    cp.start()
    cp.wait()


def _resolve_shape(total, shape):
    """torch.view-style shape resolution (single -1 allowed)."""
    shape = list(shape)
    neg = [i for i, s in enumerate(shape) if s == -1]
    if len(neg) > 1:
        raise ValueError("only one dimension can be -1")
    if neg:
        known = 1
        for i, s in enumerate(shape):
            if i != neg[0]:
                known *= s
        if known == 0 or total % known != 0:
            raise ValueError(f"cannot view size {total} as {tuple(shape)}")
        shape[neg[0]] = total // known
    prod = 1
    for s in shape:
        prod *= s
    if prod != total:
        raise ValueError(f"cannot view size {total} as {tuple(shape)}")
    return tuple(shape)


def reshape_tensor(x, shape):
    """Equivalent of torch `x.view(shape)` on a contiguous row-major tensor."""
    out_shape = _resolve_shape(x.size, shape)

    # TODO(synk): torch .view() shares storage (zero-copy); the exact JAX
    # equivalent is plain jnp.reshape(x, out_shape).  We keep one Pallas
    # HBM->HBM DMA so the op still materializes a fresh buffer via a kernel.
    if x.size == 0:
        return jnp.reshape(x, out_shape)

    copied = pl.pallas_call(
        _dma_copy_kernel,
        out_shape=jax.ShapeDtypeStruct(x.shape, x.dtype),
        in_specs=[pl.BlockSpec(memory_space=pl.ANY)],
        out_specs=pl.BlockSpec(memory_space=pl.ANY),
        scratch_shapes=[pltpu.SemaphoreType.DMA(())],
    )(x)

    # The shape change itself is pure metadata on a contiguous buffer.
    return jnp.reshape(copied, out_shape)


class ReshapeTensor:
    """Mirror of the torch nn.Module: holds the target shape."""

    def __init__(self, shape):
        self.shape = tuple(shape)

    def __call__(self, x):
        return reshape_tensor(x, self.shape)


if __name__ == "__main__":
    key = jax.random.PRNGKey(0)
    x = jax.random.normal(key, (2, 4, 16, 16), jnp.float32)

    mod = ReshapeTensor((2, -1, 16))            # -> (2, 64, 16), like torch view
    out = jax.block_until_ready(mod(x))

    ref = jnp.reshape(x, (2, 64, 16))
    assert out.shape == (2, 64, 16), out.shape
    assert out.dtype == x.dtype
    assert bool(jnp.all(out == ref))
    assert bool(jnp.all(jnp.isfinite(out)))

    # second case: total not a multiple of 128/1024 — no padding needed now.
    y = jax.random.normal(jax.random.PRNGKey(1), (3, 5, 7), jnp.float32)
    out2 = jax.block_until_ready(ReshapeTensor((105,))(y))
    assert out2.shape == (105,)
    assert bool(jnp.all(out2 == y.reshape(105)))

    # third case: bf16 dtype exercises the dtype-agnostic DMA path.
    z = jax.random.normal(jax.random.PRNGKey(2), (2, 8, 32), jnp.bfloat16)
    out3 = jax.block_until_ready(ReshapeTensor((16, 32))(z))
    assert out3.shape == (16, 32) and out3.dtype == jnp.bfloat16
    assert bool(jnp.all(out3 == z.reshape(16, 32)))

    print("KERNEL_OK")
</pallas_src>

<mosaic_0001>
module attributes {stable_mosaic.version = 11 : i64} {
  func.func @_dma_copy_kernel(%arg0: memref<2x4x16x16xf32, #tpu.memory_space<any>>, %arg1: memref<2x4x16x16xf32, #tpu.memory_space<any>>, %arg2: memref<!tpu.dma_semaphore, #tpu.memory_space<semaphore_mem>>) attributes {dimension_semantics = [], scalar_prefetch = 0 : i64, scratch_operands = 1 : i64, tpu.core_type = #tpu.core_type<tc>} {
    tpu.enqueue_dma source(%arg0 : memref<2x4x16x16xf32, #tpu.memory_space<any>>) target(%arg1 : memref<2x4x16x16xf32, #tpu.memory_space<any>>) target_semaphore(%arg2 : memref<!tpu.dma_semaphore, #tpu.memory_space<semaphore_mem>>)
    tpu.wait_dma2 semaphore(%arg2 : memref<!tpu.dma_semaphore, #tpu.memory_space<semaphore_mem>>) src(%arg0 : memref<2x4x16x16xf32, #tpu.memory_space<any>>) dst(%arg1 : memref<2x4x16x16xf32, #tpu.memory_space<any>>)
    return
  }
}

</mosaic_0001>

<bundles_post_ra>
// kernel: tpu_custom_call.1
= control target key start
LH: loop header
LB: loop body
LE: loop exit
PB: predicated region body
PF: predicated region fallthrough
CT: control target
= control target key end

     0   :  { %s36_s6 = smov [#allocation2]   ;;  %s37_s7 = smov [#allocation3]   ;;  %s55_s0 = inlined_call_operand.hbm [shape: f32[2,4,16,16], index: 0, kind: input, shape index: {}]   ;;  %s56_s1 = inlined_call_operand.hbm [shape: f32[2,4,16,16], index: 1, kind: output, shape index: {}]  }
   0x1   :  { %s38_s8 = smov 0  }
   0x2   :  { %18 = dma.general %s55_s0, 2048, %s56_s1, %s36_s6, %s37_s7, [#allocation4], %s38_s8, 0  }
   0x3   :  { %34 = dma.done.wait [#allocation2], 2048 }
   0x4   :  { %35 = vsyncadd [#allocation2], 4294965248 }
   0x5   :  { %24 = vsyncmov [#allocation2] }
   0x8   :  { %s25_s13 = vpop.sfrf %24 }
   0x9   :  { %p30_p0 = scmp.ne.s32.totalorder %s25_s13, 0 }
   0xb   :  { %29 = shalt.err (%p30_p0)  }

</bundles_post_ra>
